<compile_context>
chip_gen: v7x
topology: tpu7x:2x2x1
jax: 0.10.0
libtpu: 0.0.40
codegen_flags: <defaults>
</compile_context>

<pallas_src>
import functools

import jax
import jax.numpy as jnp
from jax import lax
from jax.experimental import pallas as pl
from jax.experimental.pallas import tpu as pltpu


def _nce_vsc_fc_kernel(scale_ref, vis_ref, text_ref, img_ref, cap_ref, out_ref,
                       a_acc, c_acc, g_acc):
    """Accumulate A/C/G over D tiles; six-term cross-entropy epilogue on last step."""
    k = pl.program_id(0)

    @pl.when(k == 0)
    def _init():
        a_acc[...] = jnp.zeros_like(a_acc)
        c_acc[...] = jnp.zeros_like(c_acc)
        g_acc[...] = jnp.zeros_like(g_acc)

    # NT matmuls on the MXU: contract the last (D-tile) dim of both (bf16) operands,
    # accumulate in f32.
    nt = (((1,), (1,)), ((), ()))
    a_acc[...] += lax.dot_general(vis_ref[...], text_ref[...], nt,
                                  preferred_element_type=jnp.float32)
    c_acc[...] += lax.dot_general(vis_ref[...], cap_ref[...], nt,
                                  preferred_element_type=jnp.float32)
    g_acc[...] += lax.dot_general(img_ref[...], cap_ref[...], nt,
                                  preferred_element_type=jnp.float32)

    @pl.when(k == pl.num_programs(0) - 1)
    def _epilogue():
        scale = scale_ref[0]                 # logit_scale = exp(temp), from SMEM
        # Scale the accumulators in place -> no extra (B,B) f32 temporaries live
        # alongside the accumulators.
        a_acc[...] *= scale                  # A = vis @ text.T * s
        c_acc[...] *= scale                  # C = vis @ cap.T  * s
        g_acc[...] *= scale                  # G = img @ cap.T  * s
        A = a_acc[...]
        C = c_acc[...]
        G = g_acc[...]
        B = A.shape[0]

        eye = (lax.broadcasted_iota(jnp.int32, (B, B), 0) ==
               lax.broadcasted_iota(jnp.int32, (B, B), 1))

        a_diag = jnp.sum(jnp.where(eye, A, 0.0), axis=1, keepdims=True)   # (B,1)
        c_diag = jnp.sum(jnp.where(eye, C, 0.0), axis=1, keepdims=True)
        g_diag = jnp.sum(jnp.where(eye, G, 0.0), axis=1, keepdims=True)

        def col_lse_sum(m_mat):
            # sum_i logsumexp_j m_mat[j, i], per-column max shift (stable).
            m = jnp.max(m_mat, axis=0, keepdims=True)                     # (1,B)
            s = jnp.sum(jnp.exp(m_mat - m), axis=0, keepdims=True)
            return jnp.sum(m + jnp.log(s))

        # terms 1, 2, 5: t2v / t2v_2 / t2v_3 cross-entropies (column logsumexp).
        t125 = (col_lse_sum(A) - jnp.sum(a_diag)
                + col_lse_sum(C) - jnp.sum(c_diag)
                + col_lse_sum(G) - jnp.sum(g_diag))

        # term 6: v2t_3 cross-entropy (row logsumexp of G).
        mg = jnp.max(G, axis=1, keepdims=True)                            # (B,1)
        g_row_lse = mg + jnp.log(jnp.sum(jnp.exp(G - mg), axis=1, keepdims=True))
        t6 = jnp.sum(g_row_lse) - jnp.sum(g_diag)

        # terms 3, 4: rows are {diag, offdiag(A), offdiag(C)} — shared per-row shift.
        # (m34 includes diag(C), a valid over-estimate of term-3's true row max.)
        m34 = jnp.maximum(jnp.max(A, axis=1, keepdims=True),
                          jnp.max(C, axis=1, keepdims=True))              # (B,1)
        eA = jnp.exp(A - m34)
        eC = jnp.exp(C - m34)
        rowA = jnp.sum(eA, axis=1, keepdims=True)
        rowC = jnp.sum(eC, axis=1, keepdims=True)
        # Diagonal exps straight from the extracted diagonals: (B,1) EUP work instead
        # of two (B,B) masked cross-lane reductions.
        dA = jnp.exp(a_diag - m34)
        dC = jnp.exp(c_diag - m34)
        lse3 = m34 + jnp.log(rowA + (rowC - dC))   # denom of CE([diag(A), off(A), off(C)], 0)
        lse4 = m34 + jnp.log(rowC + (rowA - dA))   # denom of CE([diag(C), off(A), off(C)], 0)
        t34 = (jnp.sum(lse3) - jnp.sum(a_diag)) + (jnp.sum(lse4) - jnp.sum(c_diag))

        total = t125 + t6 + t34
        out_ref[...] = jnp.full((1, 1), total * (1.0 / B), jnp.float32)


def _physical_vmem_bytes():
    """Physical VMEM capacity; falls back to the most conservative figure (v7x)."""
    try:
        return int(pltpu.get_tpu_info().vmem_capacity_bytes)
    except Exception:
        return 64 << 20


def _vmem_need_bytes(batch, tile_d, feat_bytes):
    """4 double-buffered (B, tile_d) feature tiles + 3 (B,B) f32 accumulators
    + epilogue temporaries / compiler headroom."""
    inputs = 2 * 4 * batch * tile_d * feat_bytes
    accs = 3 * batch * batch * 4
    headroom = 6 * batch * batch * 4 + (2 << 20)
    return inputs + accs + headroom


def _pick_tile_d(batch, dim, feat_bytes, budget):
    """Largest 128-aligned divisor of D whose working set fits the VMEM budget.

    Fewer, fatter D steps amortize the ~0.35us/step overhead and the (B,B)
    accumulator read-modify-write. If D is not 128-aligned the whole dim must be
    taken as one block (lane constraint)."""
    if dim % 128 != 0:
        return dim
    candidates = [t for t in range(dim, 0, -128) if dim % t == 0]
    for t in candidates:
        if _vmem_need_bytes(batch, t, feat_bytes) <= budget:
            return t
    return candidates[-1]   # smallest aligned tile; caller raises limit to the need


@functools.partial(jax.jit, static_argnames=("feat_dtype",))
def nce_learnable_temp_loss_vsc_fc(vis_feat, text_feat, img_feat, cap_feat, temp,
                                   feat_dtype=jnp.bfloat16):
    """Forward of NCELearnableTempLoss_vsc_fc via a single Pallas TPU kernel."""
    # bf16 feature feeds halve the dominant HBM traffic; accumulation stays f32 on
    # the MXU via preferred_element_type (pass feat_dtype=jnp.float32 for bit-level
    # parity with an f32 reference).
    vis = jnp.asarray(vis_feat, feat_dtype)
    text = jnp.asarray(text_feat, feat_dtype)
    img = jnp.asarray(img_feat, feat_dtype)
    cap = jnp.asarray(cap_feat, feat_dtype)
    assert text.shape[0] == cap.shape[0]
    B, D = vis.shape
    assert text.shape == (B, D) and img.shape == (B, D) and cap.shape == (B, D)

    # logit_scale = exp(temp) as a traced scalar (works for learnable / jitted temp).
    scale = jnp.exp(jnp.asarray(temp, jnp.float32)).reshape(1)

    feat_bytes = jnp.dtype(feat_dtype).itemsize
    phys_vmem = _physical_vmem_bytes()
    budget = (phys_vmem * 3) // 4           # ~48 MiB on v7x, ~96 MiB on v5e/v6e
    tile_d = _pick_tile_d(B, D, feat_bytes, budget)
    n_k = D // tile_d

    vmem_need = _vmem_need_bytes(B, tile_d, feat_bytes)
    # Never clamp the limit below the actual need (that would OOM at compile on
    # v7x); cap only at the physical capacity.
    vmem_limit = int(min(max(vmem_need, 16 << 20), phys_vmem))

    # TODO(synk): when B is below the MXU width (B < 256 on v6e/v7x), pack A and C
    # into one (B, 2B) accumulator for MXU-N / lane density.
    feat_spec = pl.BlockSpec((B, tile_d), lambda k: (0, k))

    cost = pl.CostEstimate(
        flops=2 * 3 * B * B * D + 24 * B * B,
        transcendentals=5 * B * B,
        bytes_accessed=4 * B * D * feat_bytes + 3 * B * B * 4 + 8,
    )

    out = pl.pallas_call(
        _nce_vsc_fc_kernel,
        out_shape=jax.ShapeDtypeStruct((1, 1), jnp.float32),
        grid=(n_k,),
        in_specs=[
            pl.BlockSpec(memory_space=pltpu.MemorySpace.SMEM),   # logit_scale scalar
            feat_spec,   # vis
            feat_spec,   # text
            feat_spec,   # img
            feat_spec,   # cap
        ],
        out_specs=pl.BlockSpec((1, 1), lambda k: (0, 0)),
        scratch_shapes=[
            pltpu.VMEM((B, B), jnp.float32),   # A accumulator
            pltpu.VMEM((B, B), jnp.float32),   # C accumulator
            pltpu.VMEM((B, B), jnp.float32),   # G accumulator
        ],
        compiler_params=pltpu.CompilerParams(
            dimension_semantics=("arbitrary",),
            vmem_limit_bytes=vmem_limit,
        ),
        cost_estimate=cost,
    )(scale, vis, text, img, cap)
    return out[0, 0]


def _ref_loss(vis, text, img, cap, temp):
    """Pure-JAX mirror of the PyTorch forward (for correctness checking)."""
    logit_scale = jnp.exp(temp)
    v2t = vis @ text.T * logit_scale
    t2v = v2t.T
    v2t_2 = vis @ cap.T * logit_scale
    t2v_2 = v2t_2.T
    v2t_3 = img @ cap.T * logit_scale
    t2v_3 = v2t_3.T
    B = v2t.shape[0]
    eye = jnp.eye(B, dtype=bool)
    v2t_pos = v2t[eye].reshape(B, 1)
    v2t_neg = v2t[~eye].reshape(B, B - 1)
    v2t_pos_2 = v2t_2[eye].reshape(B, 1)
    v2t_neg_2 = v2t_2[~eye].reshape(B, B - 1)
    v2t_cat = jnp.concatenate([v2t_pos, v2t_neg, v2t_neg_2], axis=1)
    v2t_2_cat = jnp.concatenate([v2t_pos_2, v2t_neg, v2t_neg_2], axis=1)
    ar = jnp.arange(B)
    zero = jnp.zeros((B,), jnp.int32)

    def ce(logits, labels):
        lse = jax.scipy.special.logsumexp(logits, axis=1)
        tgt = logits[jnp.arange(logits.shape[0]), labels]
        return jnp.mean(lse - tgt)

    return (ce(t2v, ar) + ce(t2v_2, ar) + ce(v2t_cat, zero)
            + ce(v2t_2_cat, zero) + ce(t2v_3, ar) + ce(v2t_3, ar))


if __name__ == "__main__":
    key = jax.random.PRNGKey(0)
    B, D = 8, 256                      # batch, embedding dim (small demo shapes)
    temp = jnp.float32(jnp.log(1.0 / 0.07))   # learnable temperature parameter

    kv, kt, ki, kc = jax.random.split(key, 4)
    vis = jax.random.normal(kv, (B, D), jnp.float32)
    text = jax.random.normal(kt, (B, D), jnp.float32)
    img = jax.random.normal(ki, (B, D), jnp.float32)
    cap = jax.random.normal(kc, (B, D), jnp.float32)
    # CLIP-style losses operate on unit-norm embeddings.
    vis = vis / jnp.linalg.norm(vis, axis=-1, keepdims=True)
    text = text / jnp.linalg.norm(text, axis=-1, keepdims=True)
    img = img / jnp.linalg.norm(img, axis=-1, keepdims=True)
    cap = cap / jnp.linalg.norm(cap, axis=-1, keepdims=True)

    loss = jax.block_until_ready(
        nce_learnable_temp_loss_vsc_fc(vis, text, img, cap, temp))

    # Reference on the same bf16-rounded inputs (the kernel feeds bf16 features but
    # accumulates in f32, so this comparison is tight).
    q = lambda x: x.astype(jnp.bfloat16).astype(jnp.float32)
    ref_bf16 = _ref_loss(q(vis), q(text), q(img), q(cap), temp)
    assert jnp.allclose(loss, ref_bf16, rtol=1e-3, atol=1e-3), (
        float(loss), float(ref_bf16))
    print("KERNEL_OK")
</pallas_src>

<mosaic_0001>
module attributes {stable_mosaic.version = 11 : i64} {
  func.func @_nce_vsc_fc_kernel(%arg0: i32, %arg1: memref<1xf32, #tpu.memory_space<smem>>, %arg2: memref<8x256xbf16, #tpu.memory_space<vmem>>, %arg3: memref<8x256xbf16, #tpu.memory_space<vmem>>, %arg4: memref<8x256xbf16, #tpu.memory_space<vmem>>, %arg5: memref<8x256xbf16, #tpu.memory_space<vmem>>, %arg6: memref<1x1xf32, #tpu.memory_space<vmem>>, %arg7: memref<8x8xf32, #tpu.memory_space<vmem>>, %arg8: memref<8x8xf32, #tpu.memory_space<vmem>>, %arg9: memref<8x8xf32, #tpu.memory_space<vmem>>) attributes {dimension_semantics = [#tpu.dimension_semantics<arbitrary>], iteration_bounds = array<i64: 1>, scalar_prefetch = 0 : i64, scratch_operands = 3 : i64, tpu.core_type = #tpu.core_type<tc>, window_params = [{transform_indices = @transform_0, window_bounds = array<i64: 1>}, {transform_indices = @transform_1, window_bounds = array<i64: 8, 256>}, {transform_indices = @transform_2, window_bounds = array<i64: 8, 256>}, {transform_indices = @transform_3, window_bounds = array<i64: 8, 256>}, {transform_indices = @transform_4, window_bounds = array<i64: 8, 256>}, {pipeline_mode = #tpu.pipeline_mode<synchronous>, transform_indices = @transform_5, window_bounds = array<i64: 1, 1>}]} {
    %c0_i32 = arith.constant 0 : i32
    %0 = arith.cmpi eq, %arg0, %c0_i32 : i32
    %1 = arith.extui %0 : i1 to i32
    %c0_i32_0 = arith.constant 0 : i32
    %2 = arith.cmpi ne, %1, %c0_i32_0 : i32
    scf.if %2 {
      %cst_28 = arith.constant 0.000000e+00 : f32
      %24 = vector.broadcast %cst_28 : f32 to vector<8x8xf32>
      %c0_29 = arith.constant 0 : index
      %c0_30 = arith.constant 0 : index
      %25 = vector.load %arg7[%c0_29, %c0_30] : memref<8x8xf32, #tpu.memory_space<vmem>>, vector<8x8xf32>
      tpu.vector_store %arg7[%c0_29, %c0_30], %24 {strides = array<i32>} : memref<8x8xf32, #tpu.memory_space<vmem>>, vector<8x8xf32>,
      %cst_31 = arith.constant 0.000000e+00 : f32
      %26 = vector.broadcast %cst_31 : f32 to vector<8x8xf32>
      %c0_32 = arith.constant 0 : index
      %c0_33 = arith.constant 0 : index
      %27 = vector.load %arg8[%c0_32, %c0_33] : memref<8x8xf32, #tpu.memory_space<vmem>>, vector<8x8xf32>
      tpu.vector_store %arg8[%c0_32, %c0_33], %26 {strides = array<i32>} : memref<8x8xf32, #tpu.memory_space<vmem>>, vector<8x8xf32>,
      %cst_34 = arith.constant 0.000000e+00 : f32
      %28 = vector.broadcast %cst_34 : f32 to vector<8x8xf32>
      %c0_35 = arith.constant 0 : index
      %c0_36 = arith.constant 0 : index
      %29 = vector.load %arg9[%c0_35, %c0_36] : memref<8x8xf32, #tpu.memory_space<vmem>>, vector<8x8xf32>
      tpu.vector_store %arg9[%c0_35, %c0_36], %28 {strides = array<i32>} : memref<8x8xf32, #tpu.memory_space<vmem>>, vector<8x8xf32>,
    } else {
    }
    %c0 = arith.constant 0 : index
    %c0_1 = arith.constant 0 : index
    %3 = vector.load %arg7[%c0, %c0_1] : memref<8x8xf32, #tpu.memory_space<vmem>>, vector<8x8xf32>
    %c0_2 = arith.constant 0 : index
    %c0_3 = arith.constant 0 : index
    %4 = vector.load %arg2[%c0_2, %c0_3] : memref<8x256xbf16, #tpu.memory_space<vmem>>, vector<8x256xbf16>
    %c0_4 = arith.constant 0 : index
    %c0_5 = arith.constant 0 : index
    %5 = vector.load %arg3[%c0_4, %c0_5] : memref<8x256xbf16, #tpu.memory_space<vmem>>, vector<8x256xbf16>
    %cst = arith.constant dense<0.000000e+00> : vector<8x8xf32>
    %6 = tpu.matmul %4, %5, %cst {dimension_numbers = #tpu.dot_dimension_numbers<[1], [1], [0], [0], [0, 0, 1, 0], [], []>} : vector<8x256xbf16>, vector<8x256xbf16>, vector<8x8xf32> -> vector<8x8xf32>
    %7 = arith.addf %3, %6 : vector<8x8xf32>
    %c0_6 = arith.constant 0 : index
    %c0_7 = arith.constant 0 : index
    %8 = vector.load %arg7[%c0_6, %c0_7] : memref<8x8xf32, #tpu.memory_space<vmem>>, vector<8x8xf32>
    tpu.vector_store %arg7[%c0_6, %c0_7], %7 {strides = array<i32>} : memref<8x8xf32, #tpu.memory_space<vmem>>, vector<8x8xf32>,
    %c0_8 = arith.constant 0 : index
    %c0_9 = arith.constant 0 : index
    %9 = vector.load %arg8[%c0_8, %c0_9] : memref<8x8xf32, #tpu.memory_space<vmem>>, vector<8x8xf32>
    %c0_10 = arith.constant 0 : index
    %c0_11 = arith.constant 0 : index
    %10 = vector.load %arg2[%c0_10, %c0_11] : memref<8x256xbf16, #tpu.memory_space<vmem>>, vector<8x256xbf16>
    %c0_12 = arith.constant 0 : index
    %c0_13 = arith.constant 0 : index
    %11 = vector.load %arg5[%c0_12, %c0_13] : memref<8x256xbf16, #tpu.memory_space<vmem>>, vector<8x256xbf16>
    %cst_14 = arith.constant dense<0.000000e+00> : vector<8x8xf32>
    %12 = tpu.matmul %10, %11, %cst_14 {dimension_numbers = #tpu.dot_dimension_numbers<[1], [1], [0], [0], [0, 0, 1, 0], [], []>} : vector<8x256xbf16>, vector<8x256xbf16>, vector<8x8xf32> -> vector<8x8xf32>
    %13 = arith.addf %9, %12 : vector<8x8xf32>
    %c0_15 = arith.constant 0 : index
    %c0_16 = arith.constant 0 : index
    %14 = vector.load %arg8[%c0_15, %c0_16] : memref<8x8xf32, #tpu.memory_space<vmem>>, vector<8x8xf32>
    tpu.vector_store %arg8[%c0_15, %c0_16], %13 {strides = array<i32>} : memref<8x8xf32, #tpu.memory_space<vmem>>, vector<8x8xf32>,
    %c0_17 = arith.constant 0 : index
    %c0_18 = arith.constant 0 : index
    %15 = vector.load %arg9[%c0_17, %c0_18] : memref<8x8xf32, #tpu.memory_space<vmem>>, vector<8x8xf32>
    %c0_19 = arith.constant 0 : index
    %c0_20 = arith.constant 0 : index
    %16 = vector.load %arg4[%c0_19, %c0_20] : memref<8x256xbf16, #tpu.memory_space<vmem>>, vector<8x256xbf16>
    %c0_21 = arith.constant 0 : index
    %c0_22 = arith.constant 0 : index
    %17 = vector.load %arg5[%c0_21, %c0_22] : memref<8x256xbf16, #tpu.memory_space<vmem>>, vector<8x256xbf16>
    %cst_23 = arith.constant dense<0.000000e+00> : vector<8x8xf32>
    %18 = tpu.matmul %16, %17, %cst_23 {dimension_numbers = #tpu.dot_dimension_numbers<[1], [1], [0], [0], [0, 0, 1, 0], [], []>} : vector<8x256xbf16>, vector<8x256xbf16>, vector<8x8xf32> -> vector<8x8xf32>
    %19 = arith.addf %15, %18 : vector<8x8xf32>
    %c0_24 = arith.constant 0 : index
    %c0_25 = arith.constant 0 : index
    %20 = vector.load %arg9[%c0_24, %c0_25] : memref<8x8xf32, #tpu.memory_space<vmem>>, vector<8x8xf32>
    tpu.vector_store %arg9[%c0_24, %c0_25], %19 {strides = array<i32>} : memref<8x8xf32, #tpu.memory_space<vmem>>, vector<8x8xf32>,
    %c0_i32_26 = arith.constant 0 : i32
    %21 = arith.cmpi eq, %arg0, %c0_i32_26 : i32
    %22 = arith.extui %21 : i1 to i32
    %c0_i32_27 = arith.constant 0 : i32
    %23 = arith.cmpi ne, %22, %c0_i32_27 : i32
    scf.if %23 {
      %c0_28 = arith.constant 0 : index
      %24 = memref.load %arg1[%c0_28] : memref<1xf32, #tpu.memory_space<smem>>
      %c0_29 = arith.constant 0 : index
      %c0_30 = arith.constant 0 : index
      %25 = vector.load %arg7[%c0_29, %c0_30] : memref<8x8xf32, #tpu.memory_space<vmem>>, vector<8x8xf32>
      %26 = vector.broadcast %24 : f32 to vector<8x8xf32>
      %27 = arith.mulf %25, %26 : vector<8x8xf32>
      %c0_31 = arith.constant 0 : index
      %c0_32 = arith.constant 0 : index
      %28 = vector.load %arg7[%c0_31, %c0_32] : memref<8x8xf32, #tpu.memory_space<vmem>>, vector<8x8xf32>
      tpu.vector_store %arg7[%c0_31, %c0_32], %27 {strides = array<i32>} : memref<8x8xf32, #tpu.memory_space<vmem>>, vector<8x8xf32>,
      %c0_33 = arith.constant 0 : index
      %c0_34 = arith.constant 0 : index
      %29 = vector.load %arg8[%c0_33, %c0_34] : memref<8x8xf32, #tpu.memory_space<vmem>>, vector<8x8xf32>
      %30 = vector.broadcast %24 : f32 to vector<8x8xf32>
      %31 = arith.mulf %29, %30 : vector<8x8xf32>
      %c0_35 = arith.constant 0 : index
      %c0_36 = arith.constant 0 : index
      %32 = vector.load %arg8[%c0_35, %c0_36] : memref<8x8xf32, #tpu.memory_space<vmem>>, vector<8x8xf32>
      tpu.vector_store %arg8[%c0_35, %c0_36], %31 {strides = array<i32>} : memref<8x8xf32, #tpu.memory_space<vmem>>, vector<8x8xf32>,
      %c0_37 = arith.constant 0 : index
      %c0_38 = arith.constant 0 : index
      %33 = vector.load %arg9[%c0_37, %c0_38] : memref<8x8xf32, #tpu.memory_space<vmem>>, vector<8x8xf32>
      %34 = vector.broadcast %24 : f32 to vector<8x8xf32>
      %35 = arith.mulf %33, %34 : vector<8x8xf32>
      %c0_39 = arith.constant 0 : index
      %c0_40 = arith.constant 0 : index
      %36 = vector.load %arg9[%c0_39, %c0_40] : memref<8x8xf32, #tpu.memory_space<vmem>>, vector<8x8xf32>
      tpu.vector_store %arg9[%c0_39, %c0_40], %35 {strides = array<i32>} : memref<8x8xf32, #tpu.memory_space<vmem>>, vector<8x8xf32>,
      %c0_41 = arith.constant 0 : index
      %c0_42 = arith.constant 0 : index
      %37 = vector.load %arg7[%c0_41, %c0_42] : memref<8x8xf32, #tpu.memory_space<vmem>>, vector<8x8xf32>
      %c0_43 = arith.constant 0 : index
      %c0_44 = arith.constant 0 : index
      %38 = vector.load %arg8[%c0_43, %c0_44] : memref<8x8xf32, #tpu.memory_space<vmem>>, vector<8x8xf32>
      %c0_45 = arith.constant 0 : index
      %c0_46 = arith.constant 0 : index
      %39 = vector.load %arg9[%c0_45, %c0_46] : memref<8x8xf32, #tpu.memory_space<vmem>>, vector<8x8xf32>
      %40 = tpu.iota {dimensions = array<i32: 0>} : vector<8x8xi32>
      %41 = tpu.iota {dimensions = array<i32: 1>} : vector<8x8xi32>
      %42 = arith.cmpi eq, %40, %41 : vector<8x8xi32>
      %cst_47 = arith.constant 0.000000e+00 : f32
      %43 = vector.broadcast %cst_47 : f32 to vector<8x8xf32>
      %44 = arith.select %42, %37, %43 : vector<8x8xi1>, vector<8x8xf32>
      %cst_48 = arith.constant dense<0.000000e+00> : vector<8xf32>
      %45 = vector.multi_reduction <add>, %44, %cst_48 [1] : vector<8x8xf32> to vector<8xf32>
      %46 = vector.shape_cast %45 : vector<8xf32> to vector<8x1xf32>
      %cst_49 = arith.constant 0.000000e+00 : f32
      %47 = vector.broadcast %cst_49 : f32 to vector<8x8xf32>
      %48 = arith.select %42, %38, %47 : vector<8x8xi1>, vector<8x8xf32>
      %cst_50 = arith.constant dense<0.000000e+00> : vector<8xf32>
      %49 = vector.multi_reduction <add>, %48, %cst_50 [1] : vector<8x8xf32> to vector<8xf32>
      %50 = vector.shape_cast %49 : vector<8xf32> to vector<8x1xf32>
      %cst_51 = arith.constant 0.000000e+00 : f32
      %51 = vector.broadcast %cst_51 : f32 to vector<8x8xf32>
      %52 = arith.select %42, %39, %51 : vector<8x8xi1>, vector<8x8xf32>
      %cst_52 = arith.constant dense<0.000000e+00> : vector<8xf32>
      %53 = vector.multi_reduction <add>, %52, %cst_52 [1] : vector<8x8xf32> to vector<8xf32>
      %54 = vector.shape_cast %53 : vector<8xf32> to vector<8x1xf32>
      %cst_53 = arith.constant dense<0xFF800000> : vector<8xf32>
      %55 = vector.multi_reduction <maximumf>, %37, %cst_53 [0] : vector<8x8xf32> to vector<8xf32>
      %56 = vector.shape_cast %55 : vector<8xf32> to vector<1x8xf32>
      %57 = vector.broadcast %56 : vector<1x8xf32> to vector<8x8xf32>
      %58 = arith.subf %37, %57 : vector<8x8xf32>
      %59 = math.exp %58 : vector<8x8xf32>
      %cst_54 = arith.constant dense<0.000000e+00> : vector<8xf32>
      %60 = vector.multi_reduction <add>, %59, %cst_54 [0] : vector<8x8xf32> to vector<8xf32>
      %61 = vector.shape_cast %60 : vector<8xf32> to vector<1x8xf32>
      %62 = math.log %61 : vector<1x8xf32>
      %63 = arith.addf %56, %62 : vector<1x8xf32>
      %64 = vector.shape_cast %63 : vector<1x8xf32> to vector<1x1x8xf32>
      %cst_55 = arith.constant dense<0.000000e+00> : vector<1xf32>
      %65 = vector.multi_reduction <add>, %64, %cst_55 [1, 2] : vector<1x1x8xf32> to vector<1xf32>
      %66 = vector.shape_cast %65 : vector<1xf32> to vector<1x1x1xf32>
      %67 = vector.extract %66[0, 0, 0] : f32 from vector<1x1x1xf32>
      %68 = vector.shape_cast %46 : vector<8x1xf32> to vector<1x8x1xf32>
      %cst_56 = arith.constant dense<0.000000e+00> : vector<1xf32>
      %69 = vector.multi_reduction <add>, %68, %cst_56 [1, 2] : vector<1x8x1xf32> to vector<1xf32>
      %70 = vector.shape_cast %69 : vector<1xf32> to vector<1x1x1xf32>
      %71 = vector.extract %70[0, 0, 0] : f32 from vector<1x1x1xf32>
      %72 = arith.subf %67, %71 : f32
      %cst_57 = arith.constant dense<0xFF800000> : vector<8xf32>
      %73 = vector.multi_reduction <maximumf>, %38, %cst_57 [0] : vector<8x8xf32> to vector<8xf32>
      %74 = vector.shape_cast %73 : vector<8xf32> to vector<1x8xf32>
      %75 = vector.broadcast %74 : vector<1x8xf32> to vector<8x8xf32>
      %76 = arith.subf %38, %75 : vector<8x8xf32>
      %77 = math.exp %76 : vector<8x8xf32>
      %cst_58 = arith.constant dense<0.000000e+00> : vector<8xf32>
      %78 = vector.multi_reduction <add>, %77, %cst_58 [0] : vector<8x8xf32> to vector<8xf32>
      %79 = vector.shape_cast %78 : vector<8xf32> to vector<1x8xf32>
      %80 = math.log %79 : vector<1x8xf32>
      %81 = arith.addf %74, %80 : vector<1x8xf32>
      %82 = vector.shape_cast %81 : vector<1x8xf32> to vector<1x1x8xf32>
      %cst_59 = arith.constant dense<0.000000e+00> : vector<1xf32>
      %83 = vector.multi_reduction <add>, %82, %cst_59 [1, 2] : vector<1x1x8xf32> to vector<1xf32>
      %84 = vector.shape_cast %83 : vector<1xf32> to vector<1x1x1xf32>
      %85 = vector.extract %84[0, 0, 0] : f32 from vector<1x1x1xf32>
      %86 = arith.addf %72, %85 : f32
      %87 = vector.shape_cast %50 : vector<8x1xf32> to vector<1x8x1xf32>
      %cst_60 = arith.constant dense<0.000000e+00> : vector<1xf32>
      %88 = vector.multi_reduction <add>, %87, %cst_60 [1, 2] : vector<1x8x1xf32> to vector<1xf32>
      %89 = vector.shape_cast %88 : vector<1xf32> to vector<1x1x1xf32>
      %90 = vector.extract %89[0, 0, 0] : f32 from vector<1x1x1xf32>
      %91 = arith.subf %86, %90 : f32
      %cst_61 = arith.constant dense<0xFF800000> : vector<8xf32>
      %92 = vector.multi_reduction <maximumf>, %39, %cst_61 [0] : vector<8x8xf32> to vector<8xf32>
      %93 = vector.shape_cast %92 : vector<8xf32> to vector<1x8xf32>
      %94 = vector.broadcast %93 : vector<1x8xf32> to vector<8x8xf32>
      %95 = arith.subf %39, %94 : vector<8x8xf32>
      %96 = math.exp %95 : vector<8x8xf32>
      %cst_62 = arith.constant dense<0.000000e+00> : vector<8xf32>
      %97 = vector.multi_reduction <add>, %96, %cst_62 [0] : vector<8x8xf32> to vector<8xf32>
      %98 = vector.shape_cast %97 : vector<8xf32> to vector<1x8xf32>
      %99 = math.log %98 : vector<1x8xf32>
      %100 = arith.addf %93, %99 : vector<1x8xf32>
      %101 = vector.shape_cast %100 : vector<1x8xf32> to vector<1x1x8xf32>
      %cst_63 = arith.constant dense<0.000000e+00> : vector<1xf32>
      %102 = vector.multi_reduction <add>, %101, %cst_63 [1, 2] : vector<1x1x8xf32> to vector<1xf32>
      %103 = vector.shape_cast %102 : vector<1xf32> to vector<1x1x1xf32>
      %104 = vector.extract %103[0, 0, 0] : f32 from vector<1x1x1xf32>
      %105 = arith.addf %91, %104 : f32
      %106 = vector.shape_cast %54 : vector<8x1xf32> to vector<1x8x1xf32>
      %cst_64 = arith.constant dense<0.000000e+00> : vector<1xf32>
      %107 = vector.multi_reduction <add>, %106, %cst_64 [1, 2] : vector<1x8x1xf32> to vector<1xf32>
      %108 = vector.shape_cast %107 : vector<1xf32> to vector<1x1x1xf32>
      %109 = vector.extract %108[0, 0, 0] : f32 from vector<1x1x1xf32>
      %110 = arith.subf %105, %109 : f32
      %cst_65 = arith.constant dense<0xFF800000> : vector<8xf32>
      %111 = vector.multi_reduction <maximumf>, %39, %cst_65 [1] : vector<8x8xf32> to vector<8xf32>
      %112 = vector.shape_cast %111 : vector<8xf32> to vector<8x1xf32>
      %113 = vector.broadcast %112 : vector<8x1xf32> to vector<8x8xf32>
      %114 = arith.subf %39, %113 : vector<8x8xf32>
      %115 = math.exp %114 : vector<8x8xf32>
      %cst_66 = arith.constant dense<0.000000e+00> : vector<8xf32>
      %116 = vector.multi_reduction <add>, %115, %cst_66 [1] : vector<8x8xf32> to vector<8xf32>
      %117 = vector.shape_cast %116 : vector<8xf32> to vector<8x1xf32>
      %118 = math.log %117 : vector<8x1xf32>
      %119 = arith.addf %112, %118 : vector<8x1xf32>
      %120 = vector.shape_cast %119 : vector<8x1xf32> to vector<1x8x1xf32>
      %cst_67 = arith.constant dense<0.000000e+00> : vector<1xf32>
      %121 = vector.multi_reduction <add>, %120, %cst_67 [1, 2] : vector<1x8x1xf32> to vector<1xf32>
      %122 = vector.shape_cast %121 : vector<1xf32> to vector<1x1x1xf32>
      %123 = vector.extract %122[0, 0, 0] : f32 from vector<1x1x1xf32>
      %124 = vector.shape_cast %54 : vector<8x1xf32> to vector<1x8x1xf32>
      %cst_68 = arith.constant dense<0.000000e+00> : vector<1xf32>
      %125 = vector.multi_reduction <add>, %124, %cst_68 [1, 2] : vector<1x8x1xf32> to vector<1xf32>
      %126 = vector.shape_cast %125 : vector<1xf32> to vector<1x1x1xf32>
      %127 = vector.extract %126[0, 0, 0] : f32 from vector<1x1x1xf32>
      %128 = arith.subf %123, %127 : f32
      %cst_69 = arith.constant dense<0xFF800000> : vector<8xf32>
      %129 = vector.multi_reduction <maximumf>, %37, %cst_69 [1] : vector<8x8xf32> to vector<8xf32>
      %130 = vector.shape_cast %129 : vector<8xf32> to vector<8x1xf32>
      %cst_70 = arith.constant dense<0xFF800000> : vector<8xf32>
      %131 = vector.multi_reduction <maximumf>, %38, %cst_70 [1] : vector<8x8xf32> to vector<8xf32>
      %132 = vector.shape_cast %131 : vector<8xf32> to vector<8x1xf32>
      %133 = arith.maximumf %130, %132 : vector<8x1xf32>
      %134 = vector.broadcast %133 : vector<8x1xf32> to vector<8x8xf32>
      %135 = arith.subf %37, %134 : vector<8x8xf32>
      %136 = math.exp %135 : vector<8x8xf32>
      %137 = vector.broadcast %133 : vector<8x1xf32> to vector<8x8xf32>
      %138 = arith.subf %38, %137 : vector<8x8xf32>
      %139 = math.exp %138 : vector<8x8xf32>
      %cst_71 = arith.constant dense<0.000000e+00> : vector<8xf32>
      %140 = vector.multi_reduction <add>, %136, %cst_71 [1] : vector<8x8xf32> to vector<8xf32>
      %141 = vector.shape_cast %140 : vector<8xf32> to vector<8x1xf32>
      %cst_72 = arith.constant dense<0.000000e+00> : vector<8xf32>
      %142 = vector.multi_reduction <add>, %139, %cst_72 [1] : vector<8x8xf32> to vector<8xf32>
      %143 = vector.shape_cast %142 : vector<8xf32> to vector<8x1xf32>
      %144 = arith.subf %46, %133 : vector<8x1xf32>
      %145 = math.exp %144 : vector<8x1xf32>
      %146 = arith.subf %50, %133 : vector<8x1xf32>
      %147 = math.exp %146 : vector<8x1xf32>
      %148 = arith.subf %143, %147 : vector<8x1xf32>
      %149 = arith.addf %141, %148 : vector<8x1xf32>
      %150 = math.log %149 : vector<8x1xf32>
      %151 = arith.addf %133, %150 : vector<8x1xf32>
      %152 = arith.subf %141, %145 : vector<8x1xf32>
      %153 = arith.addf %143, %152 : vector<8x1xf32>
      %154 = math.log %153 : vector<8x1xf32>
      %155 = arith.addf %133, %154 : vector<8x1xf32>
      %156 = vector.shape_cast %151 : vector<8x1xf32> to vector<1x8x1xf32>
      %cst_73 = arith.constant dense<0.000000e+00> : vector<1xf32>
      %157 = vector.multi_reduction <add>, %156, %cst_73 [1, 2] : vector<1x8x1xf32> to vector<1xf32>
      %158 = vector.shape_cast %157 : vector<1xf32> to vector<1x1x1xf32>
      %159 = vector.extract %158[0, 0, 0] : f32 from vector<1x1x1xf32>
      %160 = vector.shape_cast %46 : vector<8x1xf32> to vector<1x8x1xf32>
      %cst_74 = arith.constant dense<0.000000e+00> : vector<1xf32>
      %161 = vector.multi_reduction <add>, %160, %cst_74 [1, 2] : vector<1x8x1xf32> to vector<1xf32>
      %162 = vector.shape_cast %161 : vector<1xf32> to vector<1x1x1xf32>
      %163 = vector.extract %162[0, 0, 0] : f32 from vector<1x1x1xf32>
      %164 = arith.subf %159, %163 : f32
      %165 = vector.shape_cast %155 : vector<8x1xf32> to vector<1x8x1xf32>
      %cst_75 = arith.constant dense<0.000000e+00> : vector<1xf32>
      %166 = vector.multi_reduction <add>, %165, %cst_75 [1, 2] : vector<1x8x1xf32> to vector<1xf32>
      %167 = vector.shape_cast %166 : vector<1xf32> to vector<1x1x1xf32>
      %168 = vector.extract %167[0, 0, 0] : f32 from vector<1x1x1xf32>
      %169 = vector.shape_cast %50 : vector<8x1xf32> to vector<1x8x1xf32>
      %cst_76 = arith.constant dense<0.000000e+00> : vector<1xf32>
      %170 = vector.multi_reduction <add>, %169, %cst_76 [1, 2] : vector<1x8x1xf32> to vector<1xf32>
      %171 = vector.shape_cast %170 : vector<1xf32> to vector<1x1x1xf32>
      %172 = vector.extract %171[0, 0, 0] : f32 from vector<1x1x1xf32>
      %173 = arith.subf %168, %172 : f32
      %174 = arith.addf %164, %173 : f32
      %175 = arith.addf %110, %128 : f32
      %176 = arith.addf %175, %174 : f32
      %cst_77 = arith.constant 1.250000e-01 : f32
      %177 = arith.mulf %176, %cst_77 : f32
      %178 = vector.broadcast %177 : f32 to vector<1x1xf32>
      %c0_78 = arith.constant 0 : index
      %c0_79 = arith.constant 0 : index
      %179 = vector.load %arg6[%c0_78, %c0_79] : memref<1x1xf32, #tpu.memory_space<vmem>>, vector<1x1xf32>
      tpu.vector_store %arg6[%c0_78, %c0_79], %178 {strides = array<i32>} : memref<1x1xf32, #tpu.memory_space<vmem>>, vector<1x1xf32>,
    } else {
    }
    return
  }
  func.func @transform_0(%arg0: i32) -> i32 {
    %c0_i32 = arith.constant 0 : i32
    %c0_i32_0 = arith.constant 0 : i32
    return %c0_i32 : i32
  }
  func.func @transform_1(%arg0: i32) -> (i32, i32) {
    %c0_i32 = arith.constant 0 : i32
    %c0_i32_0 = arith.constant 0 : i32
    return %c0_i32, %arg0 : i32, i32
  }
  func.func @transform_2(%arg0: i32) -> (i32, i32) {
    %c0_i32 = arith.constant 0 : i32
    %c0_i32_0 = arith.constant 0 : i32
    return %c0_i32, %arg0 : i32, i32
  }
  func.func @transform_3(%arg0: i32) -> (i32, i32) {
    %c0_i32 = arith.constant 0 : i32
    %c0_i32_0 = arith.constant 0 : i32
    return %c0_i32, %arg0 : i32, i32
  }
  func.func @transform_4(%arg0: i32) -> (i32, i32) {
    %c0_i32 = arith.constant 0 : i32
    %c0_i32_0 = arith.constant 0 : i32
    return %c0_i32, %arg0 : i32, i32
  }
  func.func @transform_5(%arg0: i32) -> (i32, i32) {
    %c0_i32 = arith.constant 0 : i32
    %c0_i32_0 = arith.constant 0 : i32
    %c0_i32_1 = arith.constant 0 : i32
    return %c0_i32, %c0_i32_0 : i32, i32
  }
}

</mosaic_0001>

<bundles_post_ra>
// kernel: nce_learnable_temp_loss_vsc_fc.1
= control target key start
LH: loop header
LB: loop body
LE: loop exit
PB: predicated region body
PF: predicated region fallthrough
CT: control target
= control target key end

     0   :  { %vm27_vm0 = vcmask 64512   ;;  %v560_v7 = vmov 0.0   ;;  %s703_s0 = inlined_call_operand.<no memory space> [shape: f32[1], index: 0, kind: input, shape index: {}]   ;;  %s704_s1 = inlined_call_operand.vmem [shape: bf16[8,256], index: 1, kind: input, shape index: {}]   ;;  %s705_s2 = inlined_call_operand.vmem [shape: bf16[8,256], index: 2, kind: input, shape index: {}]   ;;  %s706_s3 = inlined_call_operand.vmem [shape: bf16[8,256], index: 3, kind: input, shape index: {}]   ;;  %s707_s4 = inlined_call_operand.vmem [shape: bf16[8,256], index: 4, kind: input, shape index: {}]   ;;  %s708_s5 = inlined_call_operand.hbm [shape: f32[1,1], index: 5, kind: output, shape index: {}]  }
   0x1   :  { %v33_v0 = vld [vmem:[%s705_s2] sm:$0xff]  ;;  %28 = vst.msk [vmem:[#allocation2] sm:$0xff] %vm27_vm0, %v560_v7  ;;  %29 = vst.msk [vmem:[#allocation3] sm:$0xff] %vm27_vm0, %v560_v7 }
   0x2   :  { %v93_v1 = vld [vmem:[%s707_s4] sm:$0xff]  ;;  %v471_v3 = vcombine.high %v33_v0, %v33_v0  ;;  %v470_v5 = vcombine.low %v33_v0, %v33_v0  ;;  %30 = vst.msk [vmem:[#allocation4] sm:$0xff] %vm27_vm0, %v560_v7 }
   0x3   :  { %v32_v2 = vld [vmem:[%s704_s1] sm:$0xff]  ;;  %v475_v4 = vcombine.high %v93_v1, %v93_v1  ;;  %v474_v6 = vcombine.low %v93_v1, %v93_v1 }
   0x4   :  { %11 = vsyncpa [#allocation7], 0  ;;  %v469_v8 = vcombine.high %v32_v2, %v32_v2  ;;  %48 = vmatprep.subr.bf16.mxu0 %v471_v3  ;;  %v151_v9 = vld [vmem:[%s706_s3] sm:$0xff]  ;;  %v468_v10 = vcombine.low %v32_v2, %v32_v2  ;;  %v214_v26 = vstv %s703_s0  ;;  %v226_v36 = vlaneseq  ;;  %s561_s18 = smov [#allocation6]  }
   0x5   :  { %108 = vmatprep.subr.bf16.mxu1 %v475_v4  ;;  %49 = vmatpush1.bf16.xpose.msra.mxu0 %v470_v5  ;;  %v477_v11 = vcombine.high %v151_v9, %v151_v9  ;;  %v476_v12 = vcombine.low %v151_v9, %v151_v9  ;;  %vm263_vm2 = vcmask 57344   ;;  %vm274_vm3 = vcmask 7168   ;;  %s460_s19 = sshll.u32 %s561_s18, 4  ;;  %s461_s19 = int_to_ptr.vmem [resolvable:$true] %s460_s19 }
   0x6   :  { %109 = vmatpush1.bf16.xpose.msra.mxu1 %v474_v6  ;;  %80 = vmatprep.mubr.bf16.mxu0 %v469_v8  ;;  %v620_v41 = vshrl.u32 %v226_v36, 7  ;;  %v622_v42 = vand.u32 127, %v226_v36  ;;  %vm452_vm4 = vcmask 0   ;;  %s536_s21 = scalar_lea.vmem %s461_s19, 16  ;;  %s540_s22 = scalar_lea.vmem %s461_s19, 32 }
   0x7   :  { %140 = vmatprep.mubr.bf16.mxu1 %v469_v8  ;;  %167 = vmatprep.subr.bf16.mxu0 %v475_v4  ;;  %p537_p0 = scmp.ne.s32.totalorder %s461_s19, %s536_s21  ;;  %p541_p1 = scmp.lt.s32.totalorder %s461_s19, %s461_s19 }
   0x8   :  { %v31_v13 = vld [vmem:[#allocation2] sm:$0xff]  ;;  %v91_v14 = vld [vmem:[#allocation3] sm:$0xff]  ;;  %vm230_vm1 = vcmp.eq.s32.totalorder %v620_v41, %v622_v42  ;;  %p542_p2 = scmp.lt.s32.totalorder %s540_s22, %s536_s21 }
   0x9   :  { %v150_v25 = vld [vmem:[#allocation4] sm:$0xff] }
   0xa   :  { %p543_p3 = por %p542_p2, %p541_p1 }
   0xc   :  { %81 = vmatmul.mubr.bf16.vlgmr.msra.gmra.mrb[0].mxu0 %v468_v10  ;;  %p544_p4 = pnand %p543_p3, %p537_p0 }
   0xd   :  { %141 = vmatmul.mubr.bf16.vlgmr.msra.gmra.mrb[0].mxu1 %v468_v10  ;;  %168 = vmatpush1.bf16.xpose.msra.mxu0 %v474_v6 }
   0xe   :  { %199 = vmatprep.mubr.bf16.mxu0 %v477_v11 }
  0x14   :  { %200 = vmatmul.mubr.bf16.vlgmr.msra.gmra.mrb[4].mxu0 %v476_v12 }
  0xdf   :  { %v82_v15 = vpop.f32.mrb[0].mxu0 }
  0xe0   :  { %v142_v16 = vpop.f32.mrb[0].mxu1  ;;  %v88_v17 = vadd.f32 %v82_v15, %v31_v13  ;;  %v84_v19 = vpop.f32.mrb[1].mxu0 }
  0xe1   :  { %v148_v18 = vadd.f32 %v142_v16, %v91_v14  ;;  %v144_v20 = vpop.f32.mrb[1].mxu1  ;;  %v85_v21 = vpop.f32.mrb[2].mxu0 }
  0xe2   :  { %v145_v22 = vpop.f32.mrb[2].mxu1  ;;  %90 = vst.msk [vmem:[#allocation2] sm:$0xff] %vm27_vm0, %v88_v17  ;;  %v86_v23 = vpop.f32.mrb[3].mxu0 }
  0xe3   :  { %149 = vst.msk [vmem:[#allocation3] sm:$0xff] %vm27_vm0, %v148_v18  ;;  %v146_v24 = vpop.f32.mrb[3].mxu1 }
  0xe7   :  { %v201_v27 = vpop.f32.mrb[4].mxu0 }
  0xe8   :  { %v207_v28 = vadd.f32 %v201_v27, %v150_v25  ;;  %v203_v29 = vpop.f32.mrb[5].mxu0 }
  0xe9   :  { %v213_v30 = vld [vmem:[#allocation2] sm:$0xff]  ;;  %v204_v32 = vpop.f32.mrb[6].mxu0 }
  0xea   :  { %v217_v31 = vld [vmem:[#allocation3] sm:$0xff]  ;;  %v215_v33 = vmul.f32 %v214_v26, %v213_v30  ;;  %208 = vst.msk [vmem:[#allocation4] sm:$0xff] %vm27_vm0, %v207_v28  ;;  %v205_v35 = vpop.f32.mrb[7].mxu0 }
  0xeb   :  { %v218_v34 = vmul.f32 %v217_v31, %v214_v26 }
  0xec   :  { %216 = vst.msk [vmem:[#allocation2] sm:$0xff] %vm27_vm0, %v215_v33 }
  0xed   :  { %219 = vst.msk [vmem:[#allocation3] sm:$0xff] %vm27_vm0, %v218_v34 }
  0xf1   :  { %v220_v37 = vld [vmem:[#allocation4] sm:$0xff] }
  0xf2   :  { %v221_v38 = vmul.f32 %v220_v37, %v214_v26 }
  0xf3   :  { %v615_v39 = vld [vmem:[#allocation2] sm:$0xff] }
  0xf4   :  { %222 = vst.msk [vmem:[#allocation4] sm:$0xff] %vm27_vm0, %v221_v38  ;;  %v243_v40 = vsel %vm27_vm0, %v615_v39, -inf  ;;  %v624_v43 = vld [vmem:[#allocation3] sm:$0xff]  ;;  %v231_v49 = vsel %vm230_vm1, %v615_v39, 0.0 }
  0xf5   :  { %392 = vmax.xlane.f32.xlu0 %v243_v40  ;;  %v286_v44 = vsel %vm27_vm0, %v624_v43, -inf  ;;  %v235_v45 = vsel %vm230_vm1, %v624_v43, 0.0  ;;  %v232_v50 = vsel %vm27_vm0, %v231_v49, 0.0  ;;  %v244_v51 = vrot.slane %v243_v40, 4 }
  0xf6   :  { %v236_v48 = vsel %vm27_vm0, %v235_v45, 0.0  ;;  %v287_v52 = vrot.slane %v286_v44, 4 }
  0xf7   :  { %v245_v53 = vmax.f32 %v243_v40, %v244_v51 }
  0xf8   :  { %v288_v54 = vmax.f32 %v286_v44, %v287_v52 }
  0xf9   :  { %394 = vmax.xlane.f32.xlu0 %v286_v44  ;;  %v246_v55 = vrot.slane %v245_v53, 2 }
  0xfa   :  { %v289_v57 = vrot.slane %v288_v54, 2 }
  0xfb   :  { %v634_v46 = vld [vmem:[#allocation4] sm:$0xff]  ;;  %v247_v58 = vmax.f32 %v245_v53, %v246_v55 }
  0xfc   :  { %v328_v47 = vsel %vm27_vm0, %v634_v46, -inf  ;;  %v290_v60 = vmax.f32 %v288_v54, %v289_v57  ;;  %v239_v54 = vsel %vm230_vm1, %v634_v46, 0.0 }
  0xfd   :  { %370 = vmax.xlane.f32.xlu1 %v328_v47  ;;  %237 = vadd.xlane.f32.xlu0 %v236_v48  ;;  %v329_v56 = vrot.slane %v328_v47, 4  ;;  %v248_v62 = vrot.slane %v247_v58, 1  ;;  %v240_v57 = vsel %vm27_vm0, %v239_v54, 0.0 }
  0xfe   :  { %v291_v63 = vrot.slane %v290_v60, 1 }
  0xff   :  { %v330_v59 = vmax.f32 %v328_v47, %v329_v56  ;;  %v644_v1 = vmax.f32 %v247_v58, %v248_v62 }
 0x100   :  { %v646_v2 = vmax.f32 %v290_v60, %v291_v63 }
 0x101   :  { %233 = vadd.xlane.f32.xlu1 %v232_v50  ;;  %v331_v61 = vrot.slane %v330_v59, 2  ;;  %v250_v3 = vsub.f32 %v615_v39, %v644_v1 }
 0x102   :  { %v293_v5 = vsub.f32 %v624_v43, %v646_v2 }
 0x103   :  { %v332_v0 = vmax.f32 %v330_v59, %v331_v61  ;;  %v251_v6 = vmul.f32 1.442695, %v250_v3 }
 0x104   :  { %v294_v8 = vmul.f32 1.442695, %v293_v5 }
 0x105   :  { %v333_v4 = vrot.slane %v332_v0, 1  ;;  %508 = vpow2.f32 %v251_v6 }
 0x106   :  { %510 = vpow2.f32 %v294_v8 }
 0x107   :  { %v652_v7 = vmax.f32 %v332_v0, %v333_v4 }
 0x109   :  { %v335_v9 = vsub.f32 %v634_v46, %v652_v7 }
 0x10b   :  { %v336_v10 = vmul.f32 1.442695, %v335_v9 }
 0x10d   :  { %512 = vpow2.f32 %v336_v10 }
 0x10f   :  { %v509_v11 = vpop.eup %508 }
 0x110   :  { %v511_v12 = vpop.eup %510  ;;  %v253_v13 = vsel %vm27_vm0, %v509_v11, 0.0 }
 0x111   :  { %v254_v14 = vrot.slane %v253_v13, 4  ;;  %v296_v15 = vsel %vm27_vm0, %v511_v12, 0.0 }
 0x112   :  { %v297_v17 = vrot.slane %v296_v15, 4 }
 0x113   :  { %v255_v18 = vadd.f32 %v254_v14, %v253_v13 }
 0x114   :  { %v298_v20 = vadd.f32 %v297_v17, %v296_v15 }
 0x115   :  { %v256_v21 = vrot.slane %v255_v18, 2 }
 0x116   :  { %v299_v23 = vrot.slane %v298_v20, 2 }
 0x117   :  { %v513_v16 = vpop.eup %512  ;;  %v257_v24 = vadd.f32 %v256_v21, %v255_v18 }
 0x118   :  { %v338_v19 = vsel %vm27_vm0, %v513_v16, 0.0  ;;  %v300_v27 = vadd.f32 %v299_v23, %v298_v20 }
 0x119   :  { %v339_v22 = vrot.slane %v338_v19, 4  ;;  %v258_v28 = vrot.slane %v257_v24, 1 }
 0x11a   :  { %v301_v32 = vrot.slane %v300_v27, 1 }
 0x11b   :  { %v340_v25 = vadd.f32 %v339_v22, %v338_v19  ;;  %v259_v33 = vadd.f32 %v258_v28, %v257_v24 }
 0x11c   :  { %v302_v45 = vadd.f32 %v301_v32, %v300_v27 }
 0x11d   :  { %v341_v29 = vrot.slane %v340_v25, 2  ;;  %514 = vlog2.f32 %v259_v33 }
 0x11f   :  { %v342_v34 = vadd.f32 %v341_v29, %v340_v25 }
 0x121   :  { %v343_v47 = vrot.slane %v342_v34, 1 }
 0x123   :  { %v344_v49 = vadd.f32 %v343_v47, %v342_v34 }
 0x182   :  { %v393_v26 = vpop.xlane.xlu0 %392 }
 0x186   :  { %v395_v30 = vpop.xlane.xlu0 %394 }
 0x187   :  { %v659_v31 = vmax.f32 %v393_v26, %v395_v30 }
 0x189   :  { %v400_v35 = vsub.f32 %v624_v43, %v659_v31  ;;  %v397_v36 = vsub.f32 %v615_v39, %v659_v31  ;;  %v515_v43 = vpop.eup %514 }
 0x18a   :  { %v665_v37 = vpop.xlane.xlu1 %370  ;;  %v261_v55 = vmul.f32 0.6931472, %v515_v43  ;;  %v238_v41 = vpop.xlane.xlu0 %237 }
 0x18b   :  { %v372_v38 = vsub.f32 %v634_v46, %v665_v37  ;;  %v401_v40 = vmul.f32 1.442695, %v400_v35  ;;  %v398_v44 = vmul.f32 1.442695, %v397_v36  ;;  %v317_v3 = vsel %vm274_vm3, %v238_v41, 0.0 }
 0x18c   :  { %v262_v60 = vadd.f32 %v261_v55, %v644_v1  ;;  %v412_v6 = vsub.f32 %v238_v41, %v659_v31 }
 0x18d   :  { %v373_v48 = vmul.f32 1.442695, %v372_v38  ;;  %516 = vpow2.f32 %v401_v40 }
 0x18e   :  { %518 = vpow2.f32 %v398_v44  ;;  %v234_v58 = vpop.xlane.xlu1 %233  ;;  %v264_v42 = vsel %vm263_vm2, %v262_v60, 0.0  ;;  %v413_v9 = vmul.f32 1.442695, %v412_v6 }
 0x18f   :  { %520 = vlog2.f32 %v302_v45  ;;  %v275_v63 = vsel %vm274_vm3, %v234_v58, 0.0  ;;  %v409_v8 = vsub.f32 %v234_v58, %v659_v31 }
 0x190   :  { %522 = vpow2.f32 %v373_v48 }
 0x191   :  { %524 = vlog2.f32 %v344_v49  ;;  %v410_v10 = vmul.f32 1.442695, %v409_v8 }
 0x192   :  { %526 = vpow2.f32 %v413_v9 }
 0x193   :  { %528 = vpow2.f32 %v410_v10 }
 0x197   :  { %v517_v50 = vpop.eup %516 }
 0x198   :  { %v519_v39 = vpop.eup %518  ;;  %v406_v51 = vsel %vm27_vm0, %v517_v50, 0.0 }
 0x199   :  { %v521_v52 = vpop.eup %520  ;;  %407 = vadd.xlane.f32.xlu0 %v406_v51  ;;  %v403_v53 = vsel %vm27_vm0, %v519_v39, 0.0 }
 0x19a   :  { %v523_v56 = vpop.eup %522  ;;  %404 = vadd.xlane.f32.xlu1 %v403_v53  ;;  %v304_v61 = vmul.f32 0.6931472, %v521_v52 }
 0x19b   :  { %v375_v59 = vsel %vm27_vm0, %v523_v56, 0.0  ;;  %v525_v62 = vpop.eup %524 }
 0x19c   :  { %v305_v46 = vadd.f32 %v304_v61, %v646_v2  ;;  %v346_v0 = vmul.f32 0.6931472, %v525_v62  ;;  %v527_v2 = vpop.eup %526 }
 0x19d   :  { %241 = vadd.xlane.f32.xlu0 %v240_v57  ;;  %v529_v12 = vpop.eup %528 }
 0x19e   :  { %376 = vadd.xlane.f32.xlu1 %v375_v59  ;;  %v306_v4 = vsel %vm263_vm2, %v305_v46, 0.0  ;;  %v347_v1 = vadd.f32 %v346_v0, %v652_v7 }
 0x1a0   :  { %v348_v5 = vsel %vm263_vm2, %v347_v1, 0.0 }
 0x1a1   :  { %276 = vadd.xlane.f32.xlu0 %v275_v63 }
 0x1a2   :  { %265 = vadd.xlane.f32.xlu1 %v264_v42 }
 0x1a5   :  { %318 = vadd.xlane.f32.xlu0 %v317_v3 }
 0x1a6   :  { %307 = vadd.xlane.f32.xlu1 %v306_v4 }
 0x1aa   :  { %349 = vadd.xlane.f32.xlu1 %v348_v5 }
 0x226   :  { %v408_v11 = vpop.xlane.xlu0 %407 }
 0x227   :  { %v415_v13 = vsub.f32 %v408_v11, %v527_v2  ;;  %v405_v14 = vpop.xlane.xlu1 %404 }
 0x228   :  { %v420_v15 = vsub.f32 %v405_v14, %v529_v12 }
 0x229   :  { %v416_v16 = vadd.f32 %v415_v13, %v405_v14 }
 0x22a   :  { %v421_v17 = vadd.f32 %v420_v15, %v408_v11  ;;  %v242_v7 = vpop.xlane.xlu0 %241 }
 0x22b   :  { %530 = vlog2.f32 %v416_v16  ;;  %v377_v18 = vpop.xlane.xlu1 %376  ;;  %v359_v19 = vsel %vm274_vm3, %v242_v7, 0.0 }
 0x22c   :  { %532 = vlog2.f32 %v421_v17  ;;  %360 = vadd.xlane.f32.xlu0 %v359_v19 }
 0x22d   :  { %534 = vlog2.f32 %v377_v18 }
 0x22e   :  { %v277_v20 = vpop.xlane.xlu0 %276 }
 0x22f   :  { %v278_v21 = vrot.slane %v277_v20, 4  ;;  %v266_v22 = vpop.xlane.xlu1 %265 }
 0x230   :  { %v267_v23 = vrot.slane %v266_v22, 4 }
 0x231   :  { %v279_v24 = vadd.f32 %v278_v21, %v277_v20 }
 0x232   :  { %v268_v25 = vadd.f32 %v267_v23, %v266_v22  ;;  %v319_v26 = vpop.xlane.xlu0 %318 }
 0x233   :  { %v280_v27 = vrot.slane %v279_v24, 2  ;;  %v320_v28 = vrot.slane %v319_v26, 4  ;;  %v308_v29 = vpop.xlane.xlu1 %307 }
 0x234   :  { %v269_v30 = vrot.slane %v268_v25, 2  ;;  %v309_v32 = vrot.slane %v308_v29, 4 }
 0x235   :  { %v531_v33 = vpop.eup %530  ;;  %v321_v34 = vadd.f32 %v320_v28, %v319_v26  ;;  %v281_v35 = vadd.f32 %v280_v27, %v279_v24 }
 0x236   :  { %v533_v36 = vpop.eup %532  ;;  %v310_v38 = vadd.f32 %v309_v32, %v308_v29  ;;  %v418_v40 = vmul.f32 0.6931472, %v531_v33  ;;  %v270_v44 = vadd.f32 %v269_v30, %v268_v25 }
 0x237   :  { %v535_v45 = vpop.eup %534  ;;  %v322_v47 = vrot.slane %v321_v34, 2  ;;  %v350_v48 = vpop.xlane.xlu1 %349  ;;  %v282_v49 = vrot.slane %v281_v35, 1  ;;  %v423_v43 = vmul.f32 0.6931472, %v533_v36 }
 0x238   :  { %v379_v50 = vmul.f32 0.6931472, %v535_v45  ;;  %v311_v39 = vrot.slane %v310_v38, 2  ;;  %v351_v51 = vrot.slane %v350_v48, 4  ;;  %v419_v52 = vadd.f32 %v418_v40, %v659_v31 }
 0x239   :  { %v271_v53 = vrot.slane %v270_v44, 1  ;;  %v283_v54 = vadd.f32 %v282_v49, %v281_v35  ;;  %v323_v55 = vadd.f32 %v322_v47, %v321_v34  ;;  %v424_v41 = vadd.f32 %v423_v43, %v659_v31 }
 0x23a   :  { %v352_v56 = vadd.f32 %v351_v51, %v350_v48  ;;  %v425_v57 = vsel %vm274_vm3, %v419_v52, 0.0  ;;  %v380_v58 = vadd.f32 %v379_v50, %v665_v37  ;;  %v312_v59 = vadd.f32 %v311_v39, %v310_v38 }
 0x23b   :  { %426 = vadd.xlane.f32.xlu0 %v425_v57  ;;  %v272_v60 = vadd.f32 %v271_v53, %v270_v44  ;;  %v324_v61 = vrot.slane %v323_v55, 1  ;;  %v436_v4 = vsel %vm274_vm3, %v424_v41, 0.0 }
 0x23c   :  { %v353_v62 = vrot.slane %v352_v56, 2  ;;  %v381_v63 = vsel %vm274_vm3, %v380_v58, 0.0  ;;  %v313_v42 = vrot.slane %v312_v59, 1 }
 0x23d   :  { %382 = vadd.xlane.f32.xlu1 %v381_v63  ;;  %480 = vpush %v272_v60  ;;  %v325_v46 = vadd.f32 %v324_v61, %v323_v55 }
 0x23e   :  { %482 = vpush %v283_v54  ;;  %v314_v0 = vadd.f32 %v313_v42, %v312_v59  ;;  %v354_v3 = vadd.f32 %v353_v62, %v352_v56 }
 0x240   :  { %484 = vpush %v314_v0  ;;  %v355_v37 = vrot.slane %v354_v3, 1 }
 0x241   :  { %437 = vadd.xlane.f32.xlu1 %v436_v4  ;;  %486 = vpush %v325_v46 }
 0x242   :  { %v356_v1 = vadd.f32 %v355_v37, %v354_v3 }
 0x244   :  { %488 = vpush %v356_v1 }
 0x26e   :  { %s481_s0 = spop %480 }
 0x26f   :  { %s483_s24 = spop %482 }
 0x270   :  { %s285_s26 = ssub.f32 %s481_s0, %s483_s24 }
 0x271   :  { %s485_s25 = spop %484 }
 0x272   :  { %s316_s27 = sadd.f32 %s485_s25, %s285_s26  ;;  %s487_s28 = spop %486 }
 0x274   :  { %s327_s29 = ssub.f32 %s316_s27, %s487_s28 }
 0x275   :  { %s489_s30 = spop %488 }
 0x276   :  { %s358_s8 = sadd.f32 %s489_s30, %s327_s29 }
 0x2b9   :  { %v361_v5 = vpop.xlane.xlu0 %360 }
 0x2ba   :  { %v362_v6 = vrot.slane %v361_v5, 4 }
 0x2bc   :  { %v363_v8 = vadd.f32 %v362_v6, %v361_v5 }
 0x2be   :  { %v364_v9 = vrot.slane %v363_v8, 2 }
 0x2c0   :  { %v365_v31 = vadd.f32 %v364_v9, %v363_v8 }
 0x2c2   :  { %v366_v10 = vrot.slane %v365_v31, 1 }
 0x2c4   :  { %v367_v2 = vadd.f32 %v366_v10, %v365_v31 }
 0x2c6   :  { %490 = vpush %v367_v2 }
 0x2c8   :  { %v427_v11 = vpop.xlane.xlu0 %426 }
 0x2c9   :  { %v428_v12 = vrot.slane %v427_v11, 4 }
 0x2ca   :  { %v383_v13 = vpop.xlane.xlu1 %382 }
 0x2cb   :  { %v429_v14 = vadd.f32 %v428_v12, %v427_v11  ;;  %v384_v15 = vrot.slane %v383_v13, 4 }
 0x2cd   :  { %v430_v16 = vrot.slane %v429_v14, 2  ;;  %v385_v17 = vadd.f32 %v384_v15, %v383_v13 }
 0x2ce   :  { %v438_v7 = vpop.xlane.xlu1 %437 }
 0x2cf   :  { %v431_v18 = vadd.f32 %v430_v16, %v429_v14  ;;  %v386_v19 = vrot.slane %v385_v17, 2  ;;  %v439_v20 = vrot.slane %v438_v7, 4 }
 0x2d1   :  { %v440_v21 = vadd.f32 %v439_v20, %v438_v7  ;;  %v387_v22 = vadd.f32 %v386_v19, %v385_v17  ;;  %v432_v23 = vrot.slane %v431_v18, 1 }
 0x2d3   :  { %v441_v24 = vrot.slane %v440_v21, 2  ;;  %v388_v25 = vrot.slane %v387_v22, 1  ;;  %v433_v26 = vadd.f32 %v432_v23, %v431_v18 }
 0x2d5   :  { %v442_v27 = vadd.f32 %v441_v24, %v440_v21  ;;  %v389_v28 = vadd.f32 %v388_v25, %v387_v22 }
 0x2d7   :  { %492 = vpush %v389_v28  ;;  %v443_v29 = vrot.slane %v442_v27, 1 }
 0x2d8   :  { %494 = vpush %v433_v26 }
 0x2d9   :  { %v444_v30 = vadd.f32 %v443_v29, %v442_v27 }
 0x2db   :  { %496 = vpush %v444_v30 }
 0x2f7   :  { %s491_s6 = spop %490 }
 0x2f8   :  { %s369_s11 = ssub.f32 %s358_s8, %s491_s6 }
 0x308   :  { %s493_s7 = spop %492 }
 0x309   :  { %s495_s9 = spop %494  ;;  %s391_s10 = ssub.f32 %s493_s7, %s491_s6 }
 0x30a   :  { %s435_s12 = ssub.f32 %s495_s9, %s483_s24 }
 0x30b   :  { %s448_s15 = sadd.f32 %s391_s10, %s369_s11 }
 0x30c   :  { %s497_s13 = spop %496 }
 0x30d   :  { %s446_s14 = ssub.f32 %s497_s13, %s487_s28 }
 0x30f   :  { %s447_s16 = sadd.f32 %s446_s14, %s435_s12 }
 0x311   :  { %s449_s17 = sadd.f32 %s448_s15, %s447_s16 }
 0x313   :  { %s450_s20 = smul.f32 0.125, %s449_s17 }
 0x315   :  { %v451_v32 = vstv %s450_s20 }
 0x316   :  { %453 = vst.msk [vmem:[#allocation6] sm:$0x1] %vm452_vm4, %v451_v32 }
 0x317   :  { %547 = shalt.err (!%p544_p4)
}
 0x318   :  { %s548_s2 = scalar_lea.hbm %s708_s5, 16 }
 0x319   :  { %p549_p5 = scmp.ne.s32.totalorder %s708_s5, %s548_s2  ;;  %p552_p6 = scmp.lt.u32.totalorder %s548_s2, %s708_s5 }
 0x31b   :  { %p554_p7 = pnand %p552_p6, %p549_p5 }
 0x31d   :  { %557 = shalt.err (!%p554_p7)
}
 0x31e   :  { %463 = dma.vmem_to_hbm [thread:$0]  %s461_s19, 16, %s708_s5, [#allocation7]  }
 0x31f   :  { %558 = dma.done.wait [#allocation7], 16  }
 0x320   :  { %559 = vsyncadd [#allocation7], 4294967280 }
 0x321   :  { %467 = vsyncpa [#allocation7], 1 }

</bundles_post_ra>
